<compile_context>
chip_gen: v5e
topology: v5e:2x2
jax: 0.10.0
libtpu: 0.0.40
codegen_flags: <defaults>
</compile_context>

<pallas_src>
import functools

import jax
import jax.numpy as jnp
from jax.experimental import pallas as pl
from jax.experimental.pallas import tpu as pltpu


def _round_up(x: int, m: int) -> int:
    return ((x + m - 1) // m) * m


def _actor_kernel(x_ref, w_ref, b_ref, mu_ref, *, activation: str):
    """One batch tile through the whole 4-layer MLP, fully in VMEM.

    x_ref : (TILE_B, num_inputs)  f32  -- un-padded activation tile
    w_ref : (4, PAD, PAD)         f32/bf16 -- packed, zero-padded weights (in, out)
    b_ref : (4, 1, PAD)           f32  -- packed, zero-padded biases
    mu_ref: (TILE_B, num_outputs) f32  -- narrow (lane-masked) output
    """
    if activation == "tanh":
        act = jnp.tanh
    elif activation == "swish":
        act = lambda h: h * jax.nn.sigmoid(h)
    else:
        raise ValueError("activation must be 'tanh' or 'swish'")

    n_in = x_ref.shape[-1]
    n_out = mu_ref.shape[-1]
    cdt = w_ref.dtype  # MXU compute dtype (f32 default; bf16 on v6e/v7x path)

    h = x_ref[...]
    # Layer 1: only the first n_in rows of the padded weight slab are real.
    h = act(jnp.dot(h.astype(cdt), w_ref[0, :n_in, :],
                    preferred_element_type=jnp.float32) + b_ref[0])
    # Layers 2-3: padded lanes are exact zeros end-to-end (act(0) == 0).
    h = act(jnp.dot(h.astype(cdt), w_ref[1],
                    preferred_element_type=jnp.float32) + b_ref[1])
    h = act(jnp.dot(h.astype(cdt), w_ref[2],
                    preferred_element_type=jnp.float32) + b_ref[2])
    mu = jnp.dot(h.astype(cdt), w_ref[3],
                 preferred_element_type=jnp.float32) + b_ref[3]
    mu_ref[...] = mu[:, :n_out].astype(mu_ref.dtype)


def _pack_params(params, pad, compute_dtype):
    """Pack the 4 (in,out) weights and (1,out) biases into zero-padded slabs."""
    w_packed = jnp.zeros((4, pad, pad), compute_dtype)
    for i, name in enumerate(("w1", "w2", "w3", "w4")):
        w = params[name].astype(compute_dtype)
        w_packed = w_packed.at[i, : w.shape[0], : w.shape[1]].set(w)
    b_packed = jnp.zeros((4, 1, pad), jnp.float32)
    for i, name in enumerate(("b1", "b2", "b3", "b4")):
        b = params[name].astype(jnp.float32)
        b_packed = b_packed.at[i, 0, : b.shape[1]].set(b[0])
    return w_packed, b_packed


def actor_forward(x, params, activation="tanh", tile_b=1024,
                  compute_dtype=jnp.float32):
    """x: (B, num_inputs) f32.  params: w1..w4 as (in,out), b1..b4 as (1,out)."""
    x = jnp.asarray(x, jnp.float32)
    B, num_inputs = x.shape
    hidden_size = params["w1"].shape[1]
    num_outputs = params["w4"].shape[1]

    # Common lane-dense padded feature width (multiple of 128) for the slabs.
    pad = max(_round_up(num_inputs, 128),
              _round_up(hidden_size, 128),
              _round_up(num_outputs, 128))

    # Balanced batch tiles: pick grid first, then split B evenly (x8-aligned).
    grid_n = pl.cdiv(B, tile_b)
    if B >= 16:
        grid_n = max(grid_n, 2)   # keep both v7x TensorCores busy on medium B
    if grid_n == 1:
        tile = B                  # single block == full array dim (any B legal)
        b_pad = B
    else:
        tile = _round_up(pl.cdiv(B, grid_n), 8)
        b_pad = grid_n * tile

    w_packed, b_packed = _pack_params(params, pad, compute_dtype)

    # Only the last batch tile (at most 7 rows x num_inputs) ever needs a
    # zero-filled tail; there is no lane padding of x at all.
    if b_pad != B:
        x_in = jnp.zeros((b_pad, num_inputs), jnp.float32).at[:B].set(x)
    else:
        x_in = x

    kernel = functools.partial(_actor_kernel, activation=activation)
    mu_p = pl.pallas_call(
        kernel,
        out_shape=jax.ShapeDtypeStruct((b_pad, num_outputs), jnp.float32),
        grid=(grid_n,),
        in_specs=[
            # activations: batch-tiled, un-padded feature width
            pl.BlockSpec((tile, num_inputs), lambda i: (i, 0)),
            # weights: VMEM-resident (constant block index -> fetched once)
            pl.BlockSpec((4, pad, pad), lambda i: (0, 0, 0)),
            # biases: VMEM-resident
            pl.BlockSpec((4, 1, pad), lambda i: (0, 0, 0)),
        ],
        # narrow mu output (last dim == full array dim)
        out_specs=pl.BlockSpec((tile, num_outputs), lambda i: (i, 0)),
        compiler_params=pltpu.CompilerParams(
            dimension_semantics=("parallel",)),
    )(x_in, w_packed, b_packed)

    mu = mu_p[:B] if b_pad != B else mu_p
    logstd = jnp.zeros_like(mu)
    std = jnp.ones_like(mu)   # exp(0) == 1
    return mu, std, logstd


def init_actor_params(key, num_inputs, hidden_size, num_outputs):
    """Mimics nn.Linear default init (U[-1/sqrt(fan_in), +bound]), then
    fc4.weight *= 0.1 and fc4.bias = 0, as in the module's __init__."""
    def linear(k, fan_in, fan_out):
        kw, kb = jax.random.split(k)
        bound = 1.0 / jnp.sqrt(jnp.float32(fan_in))
        w = jax.random.uniform(kw, (fan_in, fan_out), jnp.float32, -bound, bound)
        bias = jax.random.uniform(kb, (1, fan_out), jnp.float32, -bound, bound)
        return w, bias

    k1, k2, k3, k4 = jax.random.split(key, 4)
    w1, b1 = linear(k1, num_inputs, hidden_size)
    w2, b2 = linear(k2, hidden_size, hidden_size)
    w3, b3 = linear(k3, hidden_size, hidden_size)
    w4, b4 = linear(k4, hidden_size, num_outputs)
    w4 = w4 * 0.1
    b4 = b4 * 0.0
    return dict(w1=w1, b1=b1, w2=w2, b2=b2, w3=w3, b3=b3, w4=w4, b4=b4)


def actor_reference(x, params, activation="tanh"):
    def act(h):
        return jnp.tanh(h) if activation == "tanh" else h * jax.nn.sigmoid(h)
    h = act(x @ params["w1"] + params["b1"])
    h = act(h @ params["w2"] + params["b2"])
    h = act(h @ params["w3"] + params["b3"])
    mu = h @ params["w4"] + params["b4"]
    logstd = jnp.zeros_like(mu)
    return mu, jnp.exp(logstd), logstd


if __name__ == "__main__":
    num_inputs = 16
    hidden_size = 32
    num_outputs = 8

    key = jax.random.PRNGKey(0)
    kx, kx2, kp = jax.random.split(key, 3)
    params = init_actor_params(kp, num_inputs, hidden_size, num_outputs)

    # Small batch (module's typical usage) + larger batch (exercises the grid
    # split across 2 balanced tiles / both v7x TensorCores).
    x_small = jax.random.normal(kx, (2, num_inputs), jnp.float32)
    x_large = jax.random.normal(kx2, (300, num_inputs), jnp.float32)

    for activation in ("tanh", "swish"):
        for x in (x_small, x_large):
            mu, std, logstd = actor_forward(x, params, activation=activation)
            jax.block_until_ready((mu, std, logstd))
            mu_r, std_r, logstd_r = actor_reference(x, params, activation)
            assert mu.shape == mu_r.shape, (activation, mu.shape, mu_r.shape)
            assert jnp.allclose(mu, mu_r, atol=1e-5, rtol=1e-5), activation
            assert jnp.allclose(std, std_r), activation
            assert jnp.allclose(logstd, logstd_r), activation

    # Optional bf16 MXU path (v6e/v7x): same kernel, weights/activations in
    # bf16 for the dots, f32 accumulation. Looser tolerance by construction.
    mu_bf, _, _ = actor_forward(x_large, params, activation="tanh",
                                compute_dtype=jnp.bfloat16)
    jax.block_until_ready(mu_bf)
    mu_r, _, _ = actor_reference(x_large, params, "tanh")
    assert mu_bf.shape == mu_r.shape
    assert jnp.allclose(mu_bf, mu_r, atol=5e-2), "bf16 path diverged"

    print("KERNEL_OK")
</pallas_src>

<mosaic_0001>
module attributes {stable_mosaic.version = 11 : i64} {
  func.func @_actor_kernel(%arg0: i32, %arg1: memref<2x16xf32, #tpu.memory_space<vmem>>, %arg2: memref<4x128x128xf32, #tpu.memory_space<vmem>>, %arg3: memref<4x1x128xf32, #tpu.memory_space<vmem>>, %arg4: memref<2x8xf32, #tpu.memory_space<vmem>>) attributes {dimension_semantics = [#tpu.dimension_semantics<parallel>], iteration_bounds = array<i64: 1>, scalar_prefetch = 0 : i64, scratch_operands = 0 : i64, tpu.core_type = #tpu.core_type<tc>, window_params = [{transform_indices = @transform_0, window_bounds = array<i64: 2, 16>}, {pipeline_mode = #tpu.pipeline_mode<synchronous>, transform_indices = @transform_1, window_bounds = array<i64: 4, 128, 128>}, {pipeline_mode = #tpu.pipeline_mode<synchronous>, transform_indices = @transform_2, window_bounds = array<i64: 4, 1, 128>}, {transform_indices = @transform_3, window_bounds = array<i64: 2, 8>}]} {
    %c0 = arith.constant 0 : index
    %c0_0 = arith.constant 0 : index
    %0 = vector.load %arg1[%c0, %c0_0] : memref<2x16xf32, #tpu.memory_space<vmem>>, vector<2x16xf32>
    %c0_1 = arith.constant 0 : index
    %c0_2 = arith.constant 0 : index
    %c0_3 = arith.constant 0 : index
    %1 = vector.load %arg2[%c0_1, %c0_2, %c0_3] : memref<4x128x128xf32, #tpu.memory_space<vmem>>, vector<1x16x128xf32>
    %2 = vector.shape_cast %1 : vector<1x16x128xf32> to vector<16x128xf32>
    %cst = arith.constant dense<0.000000e+00> : vector<2x128xf32>
    %3 = tpu.matmul %0, %2, %cst {dimension_numbers = #tpu.dot_dimension_numbers<[1], [0], [0], [1], [0, 0, 1, 1], [], []>} : vector<2x16xf32>, vector<16x128xf32>, vector<2x128xf32> -> vector<2x128xf32>
    %c0_4 = arith.constant 0 : index
    %c0_5 = arith.constant 0 : index
    %c0_6 = arith.constant 0 : index
    %4 = vector.load %arg3[%c0_4, %c0_5, %c0_6] : memref<4x1x128xf32, #tpu.memory_space<vmem>>, vector<1x1x128xf32>
    %5 = vector.shape_cast %4 : vector<1x1x128xf32> to vector<1x128xf32>
    %6 = vector.broadcast %5 : vector<1x128xf32> to vector<2x128xf32>
    %7 = arith.addf %3, %6 : vector<2x128xf32>
    %8 = math.tanh %7 : vector<2x128xf32>
    %c1 = arith.constant 1 : index
    %c0_7 = arith.constant 0 : index
    %c0_8 = arith.constant 0 : index
    %9 = vector.load %arg2[%c1, %c0_7, %c0_8] : memref<4x128x128xf32, #tpu.memory_space<vmem>>, vector<1x128x128xf32>
    %10 = vector.shape_cast %9 : vector<1x128x128xf32> to vector<128x128xf32>
    %cst_9 = arith.constant dense<0.000000e+00> : vector<2x128xf32>
    %11 = tpu.matmul %8, %10, %cst_9 {dimension_numbers = #tpu.dot_dimension_numbers<[1], [0], [0], [1], [0, 0, 1, 1], [], []>} : vector<2x128xf32>, vector<128x128xf32>, vector<2x128xf32> -> vector<2x128xf32>
    %c1_10 = arith.constant 1 : index
    %c0_11 = arith.constant 0 : index
    %c0_12 = arith.constant 0 : index
    %12 = vector.load %arg3[%c1_10, %c0_11, %c0_12] : memref<4x1x128xf32, #tpu.memory_space<vmem>>, vector<1x1x128xf32>
    %13 = vector.shape_cast %12 : vector<1x1x128xf32> to vector<1x128xf32>
    %14 = vector.broadcast %13 : vector<1x128xf32> to vector<2x128xf32>
    %15 = arith.addf %11, %14 : vector<2x128xf32>
    %16 = math.tanh %15 : vector<2x128xf32>
    %c2 = arith.constant 2 : index
    %c0_13 = arith.constant 0 : index
    %c0_14 = arith.constant 0 : index
    %17 = vector.load %arg2[%c2, %c0_13, %c0_14] : memref<4x128x128xf32, #tpu.memory_space<vmem>>, vector<1x128x128xf32>
    %18 = vector.shape_cast %17 : vector<1x128x128xf32> to vector<128x128xf32>
    %cst_15 = arith.constant dense<0.000000e+00> : vector<2x128xf32>
    %19 = tpu.matmul %16, %18, %cst_15 {dimension_numbers = #tpu.dot_dimension_numbers<[1], [0], [0], [1], [0, 0, 1, 1], [], []>} : vector<2x128xf32>, vector<128x128xf32>, vector<2x128xf32> -> vector<2x128xf32>
    %c2_16 = arith.constant 2 : index
    %c0_17 = arith.constant 0 : index
    %c0_18 = arith.constant 0 : index
    %20 = vector.load %arg3[%c2_16, %c0_17, %c0_18] : memref<4x1x128xf32, #tpu.memory_space<vmem>>, vector<1x1x128xf32>
    %21 = vector.shape_cast %20 : vector<1x1x128xf32> to vector<1x128xf32>
    %22 = vector.broadcast %21 : vector<1x128xf32> to vector<2x128xf32>
    %23 = arith.addf %19, %22 : vector<2x128xf32>
    %24 = math.tanh %23 : vector<2x128xf32>
    %c3 = arith.constant 3 : index
    %c0_19 = arith.constant 0 : index
    %c0_20 = arith.constant 0 : index
    %25 = vector.load %arg2[%c3, %c0_19, %c0_20] : memref<4x128x128xf32, #tpu.memory_space<vmem>>, vector<1x128x128xf32>
    %26 = vector.shape_cast %25 : vector<1x128x128xf32> to vector<128x128xf32>
    %cst_21 = arith.constant dense<0.000000e+00> : vector<2x128xf32>
    %27 = tpu.matmul %24, %26, %cst_21 {dimension_numbers = #tpu.dot_dimension_numbers<[1], [0], [0], [1], [0, 0, 1, 1], [], []>} : vector<2x128xf32>, vector<128x128xf32>, vector<2x128xf32> -> vector<2x128xf32>
    %c3_22 = arith.constant 3 : index
    %c0_23 = arith.constant 0 : index
    %c0_24 = arith.constant 0 : index
    %28 = vector.load %arg3[%c3_22, %c0_23, %c0_24] : memref<4x1x128xf32, #tpu.memory_space<vmem>>, vector<1x1x128xf32>
    %29 = vector.shape_cast %28 : vector<1x1x128xf32> to vector<1x128xf32>
    %30 = vector.broadcast %29 : vector<1x128xf32> to vector<2x128xf32>
    %31 = arith.addf %27, %30 : vector<2x128xf32>
    %32 = vector.extract_strided_slice %31 {offsets = [0, 0], sizes = [2, 8], strides = [1, 1]} : vector<2x128xf32> to vector<2x8xf32>
    %c0_25 = arith.constant 0 : index
    %c0_26 = arith.constant 0 : index
    %33 = vector.load %arg4[%c0_25, %c0_26] : memref<2x8xf32, #tpu.memory_space<vmem>>, vector<2x8xf32>
    tpu.vector_store %arg4[%c0_25, %c0_26], %32 {strides = array<i32>} : memref<2x8xf32, #tpu.memory_space<vmem>>, vector<2x8xf32>,
    return
  }
  func.func @transform_0(%arg0: i32) -> (i32, i32) {
    %c0_i32 = arith.constant 0 : i32
    %c0_i32_0 = arith.constant 0 : i32
    return %arg0, %c0_i32 : i32, i32
  }
  func.func @transform_1(%arg0: i32) -> (i32, i32, i32) {
    %c0_i32 = arith.constant 0 : i32
    %c0_i32_0 = arith.constant 0 : i32
    %c0_i32_1 = arith.constant 0 : i32
    %c0_i32_2 = arith.constant 0 : i32
    return %c0_i32, %c0_i32_0, %c0_i32_1 : i32, i32, i32
  }
  func.func @transform_2(%arg0: i32) -> (i32, i32, i32) {
    %c0_i32 = arith.constant 0 : i32
    %c0_i32_0 = arith.constant 0 : i32
    %c0_i32_1 = arith.constant 0 : i32
    %c0_i32_2 = arith.constant 0 : i32
    return %c0_i32, %c0_i32_0, %c0_i32_1 : i32, i32, i32
  }
  func.func @transform_3(%arg0: i32) -> (i32, i32) {
    %c0_i32 = arith.constant 0 : i32
    %c0_i32_0 = arith.constant 0 : i32
    return %arg0, %c0_i32 : i32, i32
  }
}

</mosaic_0001>

<bundles_post_ra>
// kernel: tpu_custom_call.1
= control target key start
LH: loop header
LB: loop body
LE: loop exit
PB: predicated region body
PF: predicated region fallthrough
CT: control target
= control target key end

     0   :  { %8 = vsyncpa [#allocation3], 0  ;;  %s401_s0 = inlined_call_operand.hbm [shape: f32[2,16], index: 0, kind: input, shape index: {}]   ;;  %s402_s1 = inlined_call_operand.hbm [shape: f32[4,128,128], index: 1, kind: input, shape index: {}]   ;;  %s403_s2 = inlined_call_operand.hbm [shape: f32[4,1,128], index: 2, kind: input, shape index: {}]   ;;  %s404_s3 = inlined_call_operand.hbm [shape: f32[2,8], index: 3, kind: output, shape index: {}]  }
   0x1   :  { %9 = vsyncpa [#allocation6], 0  ;;  %s26_s14 = sshll.u32 %s402_s1, 4  ;;  %s27_s14 = int_to_ptr.hbm [resolvable:$true] %s26_s14 }
   0x2   :  { %10 = vsyncpa [#allocation4], 0  ;;  %s361_s15 = smov [#allocation5]   ;;  %s16_s19 = sshll.u32 %s401_s0, 4  ;;  %s17_s19 = int_to_ptr.hbm [resolvable:$true] %s16_s19 }
   0x3   :  { %s28_s16 = sshll.u32 %s361_s15, 4  ;;  %s362_s20 = smov 128   ;;  %s29_s16 = int_to_ptr.vmem [resolvable:$true] %s28_s16 }
   0x4   :  { %s363_s21 = smov 8   ;;  %s364_s22 = smov [#allocation2]  }
   0x5   :  { %34 = dma.hbm_to_vmem [thread:$0]  %s27_s14, 8192, %s29_s16, [#allocation6], %s362_s20, %s362_s20, %s363_s21  }
   0x6   :  { %s18_s23 = sshll.u32 %s364_s22, 4  ;;  %s39_s26 = sshll.u32 %s403_s2, 4  ;;  %s19_s23 = int_to_ptr.vmem [resolvable:$true] %s18_s23  ;;  %s40_s26 = int_to_ptr.hbm [resolvable:$true] %s39_s26 }
   0x7   :  { %21 = dma.hbm_to_vmem [thread:$0]  %s17_s19, 32, %s19_s23, [#allocation3]  }
   0x8   :  { %s365_s1 = smov [#allocation7]   ;;  %s366_s28 = smov 16  }
   0x9   :  { %s41_s27 = sshll.u32 %s365_s1, 4  ;;  %s367_s29 = smov 1   ;;  %s42_s27 = int_to_ptr.vmem [resolvable:$true] %s41_s27 }
   0xa   :  { %47 = dma.hbm_to_vmem [thread:$0]  %s40_s26, 64, %s42_s27, [#allocation6], %s366_s28, %s366_s28, %s367_s29  }
   0xb   :  { %355 = dma.done.wait [#allocation3], 32  }
   0xc   :  { %356 = vsyncadd [#allocation3], 4294967264 }
   0xd   :  { %357 = dma.done.wait [#allocation6], 8256  }
   0xe   :  { %358 = vsyncadd [#allocation6], 4294959040  ;;  %v62_v0 = vld [vmem:[#allocation5 + $0x8] sm:$0xff]  ;;  %v61_v1 = vld [vmem:[#allocation5] sm:$0xff]  ;;  %vm67_vm0 = vcmask 130048   ;;  %s368_s0 = smov [#allocation8]  }
   0xf   :  { %85 = vmatpush.msra.mxu0 %v62_v0  ;;  %v60_v2 = vld [vmem:[#allocation2] sm:$0x3]  ;;  %v107_v4 = vld [vmem:[#allocation5 + $0xf0] sm:$0xff]  ;;  %v106_v5 = vld [vmem:[#allocation5 + $0xe8] sm:$0xff]  ;;  %s227_s2 = sshll.u32 %s368_s0, 4  ;;  %s229_s5 = sshll.u32 %s404_s3, 4  ;;  %s228_s2 = int_to_ptr.vmem [resolvable:$true] %s227_s2  ;;  %s230_s5 = int_to_ptr.hbm [resolvable:$true] %s229_s5 }
  0x10   :  { %v108_v3 = vld [vmem:[#allocation5 + $0xf8] sm:$0xff]  ;;  %v105_v6 = vld [vmem:[#allocation5 + $0xe0] sm:$0xff]  ;;  %v103_v8 = vld [vmem:[#allocation5 + $0xd0] sm:$0xff]  ;;  %vm220_vm1 = vcmask 58368  }
  0x11   :  { %114 = vmatpush.msra.mxu1 %v108_v3  ;;  %86 = vmatpush.msra.mxu0 %v61_v1  ;;  %v104_v7 = vld [vmem:[#allocation5 + $0xd8] sm:$0xff]  ;;  %v102_v9 = vld [vmem:[#allocation5 + $0xc8] sm:$0xff]  ;;  %v101_v10 = vld [vmem:[#allocation5 + $0xc0] sm:$0xff] }
  0x12   :  { %240 = vmatmul.msk.f32.vlgmr.msra.gmra.mxu0 %vm67_vm0, %v60_v2  ;;  %v100_v11 = vld [vmem:[#allocation5 + $0xb8] sm:$0xff]  ;;  %v99_v12 = vld [vmem:[#allocation5 + $0xb0] sm:$0xff]  ;;  %v98_v13 = vld [vmem:[#allocation5 + $0xa8] sm:$0xff] }
  0x13   :  { %115 = vmatpush.msra.mxu1 %v107_v4  ;;  %v97_v14 = vld [vmem:[#allocation5 + $0xa0] sm:$0xff]  ;;  %v96_v15 = vld [vmem:[#allocation5 + $0x98] sm:$0xff]  ;;  %v95_v16 = vld [vmem:[#allocation5 + $0x90] sm:$0xff] }
  0x14   :  { %v94_v17 = vld [vmem:[#allocation5 + $0x88] sm:$0xff]  ;;  %v93_v18 = vld [vmem:[#allocation5 + $0x80] sm:$0xff]  ;;  %v151_v19 = vld [vmem:[#allocation5 + $0x178] sm:$0xff] }
  0x15   :  { %116 = vmatpush.msra.mxu1 %v106_v5  ;;  %v150_v20 = vld [vmem:[#allocation5 + $0x170] sm:$0xff]  ;;  %157 = vmatpush.msra.mxu2 %v151_v19  ;;  %v149_v21 = vld [vmem:[#allocation5 + $0x168] sm:$0xff]  ;;  %v148_v22 = vld [vmem:[#allocation5 + $0x160] sm:$0xff] }
  0x16   :  { %v147_v23 = vld [vmem:[#allocation5 + $0x158] sm:$0xff]  ;;  %v146_v24 = vld [vmem:[#allocation5 + $0x150] sm:$0xff]  ;;  %v145_v25 = vld [vmem:[#allocation5 + $0x148] sm:$0xff] }
  0x17   :  { %117 = vmatpush.msra.mxu1 %v105_v6  ;;  %158 = vmatpush.msra.mxu2 %v150_v20  ;;  %v144_v26 = vld [vmem:[#allocation5 + $0x140] sm:$0xff]  ;;  %v143_v27 = vld [vmem:[#allocation5 + $0x138] sm:$0xff]  ;;  %v142_v28 = vld [vmem:[#allocation5 + $0x130] sm:$0xff] }
  0x18   :  { %v141_v29 = vld [vmem:[#allocation5 + $0x128] sm:$0xff]  ;;  %v249_v30 = vld [vmem:[#allocation7] ss:$0 sm:$0xff]  ;;  %v139_v35 = vld [vmem:[#allocation5 + $0x118] sm:$0xff] }
  0x19   :  { %118 = vmatpush.msra.mxu1 %v104_v7  ;;  %159 = vmatpush.msra.mxu2 %v149_v21  ;;  %v140_v34 = vld [vmem:[#allocation5 + $0x120] sm:$0xff]  ;;  %v138_v36 = vld [vmem:[#allocation5 + $0x110] sm:$0xff]  ;;  %v137_v37 = vld [vmem:[#allocation5 + $0x108] sm:$0xff] }
  0x1a   :  { %v136_v38 = vld [vmem:[#allocation5 + $0x100] sm:$0xff]  ;;  %v194_v39 = vld [vmem:[#allocation5 + $0x1f8] sm:$0xff]  ;;  %v193_v40 = vld [vmem:[#allocation5 + $0x1f0] sm:$0xff] }
  0x1b   :  { %119 = vmatpush.msra.mxu1 %v103_v8  ;;  %160 = vmatpush.msra.mxu2 %v148_v22  ;;  %v192_v41 = vld [vmem:[#allocation5 + $0x1e8] sm:$0xff]  ;;  %v191_v42 = vld [vmem:[#allocation5 + $0x1e0] sm:$0xff]  ;;  %v190_v43 = vld [vmem:[#allocation5 + $0x1d8] sm:$0xff] }
  0x1c   :  { %200 = vmatpush.msra.mxu3 %v194_v39  ;;  %v189_v44 = vld [vmem:[#allocation5 + $0x1d0] sm:$0xff]  ;;  %v188_v45 = vld [vmem:[#allocation5 + $0x1c8] sm:$0xff]  ;;  %v187_v46 = vld [vmem:[#allocation5 + $0x1c0] sm:$0xff] }
  0x1d   :  { %120 = vmatpush.msra.mxu1 %v102_v9  ;;  %161 = vmatpush.msra.mxu2 %v147_v23  ;;  %v186_v47 = vld [vmem:[#allocation5 + $0x1b8] sm:$0xff]  ;;  %v185_v48 = vld [vmem:[#allocation5 + $0x1b0] sm:$0xff]  ;;  %v184_v49 = vld [vmem:[#allocation5 + $0x1a8] sm:$0xff] }
  0x1e   :  { %201 = vmatpush.msra.mxu3 %v193_v40  ;;  %v250_v50 = vld [vmem:[#allocation7 + $0x1] ss:$0 sm:$0xff]  ;;  %v182_v55 = vld [vmem:[#allocation5 + $0x198] sm:$0xff]  ;;  %v181_v56 = vld [vmem:[#allocation5 + $0x190] sm:$0xff] }
  0x1f   :  { %121 = vmatpush.msra.mxu1 %v101_v10  ;;  %162 = vmatpush.msra.mxu2 %v146_v24  ;;  %v183_v54 = vld [vmem:[#allocation5 + $0x1a0] sm:$0xff]  ;;  %v180_v57 = vld [vmem:[#allocation5 + $0x188] sm:$0xff] }
  0x20   :  { %202 = vmatpush.msra.mxu3 %v192_v41  ;;  %v179_v58 = vld [vmem:[#allocation5 + $0x180] sm:$0xff] }
  0x21   :  { %122 = vmatpush.msra.mxu1 %v100_v11  ;;  %163 = vmatpush.msra.mxu2 %v145_v25  ;;  %v251_v59 = vld [vmem:[#allocation7 + $0x2] ss:$0 sm:$0xff]  ;;  %v252_v63 = vld [vmem:[#allocation7 + $0x3] ss:$0 sm:$0xff] }
  0x22   :  { %203 = vmatpush.msra.mxu3 %v191_v42 }
  0x23   :  { %123 = vmatpush.msra.mxu1 %v99_v12  ;;  %164 = vmatpush.msra.mxu2 %v144_v26 }
  0x24   :  { %204 = vmatpush.msra.mxu3 %v190_v43 }
  0x25   :  { %124 = vmatpush.msra.mxu1 %v98_v13  ;;  %165 = vmatpush.msra.mxu2 %v143_v27 }
  0x26   :  { %205 = vmatpush.msra.mxu3 %v189_v44 }
  0x27   :  { %125 = vmatpush.msra.mxu1 %v97_v14  ;;  %166 = vmatpush.msra.mxu2 %v142_v28 }
  0x28   :  { %206 = vmatpush.msra.mxu3 %v188_v45 }
  0x29   :  { %126 = vmatpush.msra.mxu1 %v96_v15  ;;  %167 = vmatpush.msra.mxu2 %v141_v29 }
  0x2a   :  { %207 = vmatpush.msra.mxu3 %v187_v46 }
  0x2b   :  { %127 = vmatpush.msra.mxu1 %v95_v16  ;;  %168 = vmatpush.msra.mxu2 %v140_v34 }
  0x2c   :  { %208 = vmatpush.msra.mxu3 %v186_v47 }
  0x2d   :  { %128 = vmatpush.msra.mxu1 %v94_v17  ;;  %169 = vmatpush.msra.mxu2 %v139_v35 }
  0x2e   :  { %209 = vmatpush.msra.mxu3 %v185_v48 }
  0x2f   :  { %129 = vmatpush.msra.mxu1 %v93_v18  ;;  %170 = vmatpush.msra.mxu2 %v138_v36 }
  0x30   :  { %210 = vmatpush.msra.mxu3 %v184_v49 }
  0x31   :  { %171 = vmatpush.msra.mxu2 %v137_v37 }
  0x32   :  { %211 = vmatpush.msra.mxu3 %v183_v54 }
  0x33   :  { %172 = vmatpush.msra.mxu2 %v136_v38 }
  0x34   :  { %212 = vmatpush.msra.mxu3 %v182_v55 }
  0x36   :  { %213 = vmatpush.msra.mxu3 %v181_v56 }
  0x38   :  { %214 = vmatpush.msra.mxu3 %v180_v57 }
  0x3a   :  { %215 = vmatpush.msra.mxu3 %v179_v58 }
  0x8f   :  { %v88_v31 = vpop.f32.mrf.mxu0 }
  0x90   :  { %v89_v32 = vadd.f32 %v249_v30, %v88_v31 }
  0x92   :  { %253 = vtanh.f32 %v89_v32 }
  0x98   :  { %v254_v33 = vpop.eup %253 }
  0x99   :  { %130 = vmatmul.f32.vlgmr.msra.gmra.mxu1 %v254_v33 }
 0x116   :  { %v131_v51 = vpop.f32.mrf.mxu1 }
 0x117   :  { %v132_v52 = vadd.f32 %v250_v50, %v131_v51 }
 0x119   :  { %255 = vtanh.f32 %v132_v52 }
 0x11f   :  { %v256_v53 = vpop.eup %255 }
 0x120   :  { %173 = vmatmul.f32.vlgmr.msra.gmra.mxu2 %v256_v53 }
 0x1a3   :  { %v174_v60 = vpop.f32.mrf.mxu2 }
 0x1a4   :  { %v175_v61 = vadd.f32 %v251_v59, %v174_v60 }
 0x1a6   :  { %257 = vtanh.f32 %v175_v61 }
 0x1ac   :  { %v258_v62 = vpop.eup %257 }
 0x1ad   :  { %216 = vmatmul.f32.vlgmr.msra.gmra.mxu3 %v258_v62 }
 0x230   :  { %v217_v0 = vpop.f32.mrf.mxu3 }
 0x231   :  { %v218_v1 = vadd.f32 %v252_v63, %v217_v0 }
 0x233   :  { %221 = vst.msk [vmem:[#allocation8] sm:$0x3] %vm220_vm1, %v218_v1 }
 0x234   :  { %232 = dma.vmem_to_hbm [thread:$0]  %s228_s2, 32, %s230_s5, [#allocation4]  }
 0x235   :  { %359 = dma.done.wait [#allocation4], 32  }
 0x236   :  { %360 = vsyncadd [#allocation4], 4294967264 }
 0x237   :  { %237 = vsyncpa [#allocation3], 1 }
 0x238   :  { %238 = vsyncpa [#allocation6], 1 }
 0x239   :  { %239 = vsyncpa [#allocation4], 1 }

</bundles_post_ra>
